<compile_context>
chip_gen: v7x
topology: tpu7x:2x2x1
jax: 0.10.0
libtpu: 0.0.40
codegen_flags: <defaults>
</compile_context>

<pallas_src>
import math
import functools

import jax
import jax.numpy as jnp
from jax import lax
from jax.experimental import pallas as pl
from jax.experimental.pallas import tpu as pltpu


# ---------------------------------------------------------------------------
# Helpers
# ---------------------------------------------------------------------------
def _pick_q_tile(seq_len, target):
    """Largest query tile <= target that divides seq_len and is sublane(8)-aligned."""
    if seq_len <= target:
        return seq_len
    for t in range(min(target, seq_len), 7, -1):
        if seq_len % t == 0 and t % 8 == 0:
            return t
    return seq_len


def _vmem_bytes_estimate(S, D, inner, tq, weight_itemsize):
    f32 = 4
    est = 0
    est += 2 * S * D * weight_itemsize                                   # x block (double buffered)
    est += 2 * S * f32                                                   # mask bias block
    est += 2 * (D * inner + D * 2 * inner + inner * D) * weight_itemsize # resident weights
    est += 2 * (inner + 2 * inner + D) * f32                             # projection biases
    est += 2 * tq * D * f32                                              # output block
    est += S * 2 * inner * weight_itemsize                               # K/V scratch
    # live intermediates: scores/probs (f32), q tile, ctx, kv projection temp
    est += 4 * tq * S * f32 + 2 * tq * inner * f32 + S * 2 * inner * f32
    return est


# ---------------------------------------------------------------------------
# Fused kernel: one grid step = (batch element, query tile), all heads.
#   x     : (1, S, D)       activations for the whole sequence (matmul dtype)
#   bias  : (1, 1, S)       additive mask bias = -1e6 * (1 - mask), f32
#   wq    : (D, inner)      Q weights, 1/sqrt(hd) pre-folded (matmul dtype)
#   bq    : (1, inner)      f32
#   wkv   : (D, 2*inner)    K|V weights (matmul dtype)
#   bkv   : (1, 2*inner)    f32
#   wo    : (inner, D)      output projection (matmul dtype)
#   bo    : (1, D)          f32
#   out   : (1, tq, D)      f32
#   kv_ref: (S, 2*inner)    VMEM scratch, persistent across query tiles
# ---------------------------------------------------------------------------
def _attention_kernel(x_ref, bias_ref, wq_ref, bq_ref, wkv_ref, bkv_ref,
                      wo_ref, bo_ref, o_ref, kv_ref,
                      *, num_head, head_dim, tq):
    S = x_ref.shape[1]
    inner = num_head * head_dim
    mdt = kv_ref.dtype
    q_idx = pl.program_id(1)

    # ---- K/V projection: once per batch element (first query tile). ----
    @pl.when(q_idx == 0)
    def _():
        x_full = x_ref[0]                                                # (S, D)
        kv = jnp.dot(x_full, wkv_ref[...],
                     preferred_element_type=jnp.float32) + bkv_ref[...]  # (S, 2*inner) f32
        kv_ref[...] = kv.astype(mdt)                                     # single cast + store

    # ---- Q projection for this query tile (scale folded into wq/bq). ----
    row = pl.multiple_of(q_idx * tq, tq)
    xq = x_ref[0, pl.ds(row, tq), :]                                     # (tq, D)
    q_all = (jnp.dot(xq, wq_ref[...],
                     preferred_element_type=jnp.float32)
             + bq_ref[...]).astype(mdt)                                  # (tq, inner)

    kv = kv_ref[...]                                                     # (S, 2*inner)
    bias = bias_ref[0]                                                   # (1, S) f32

    # ---- Per-head attention; contexts gathered for one merged output projection. ----
    ctx_parts = []
    for h in range(num_head):
        lo, hi = h * head_dim, (h + 1) * head_dim
        q_h = q_all[:, lo:hi]                                            # (tq, hd)
        k_h = kv[:, lo:hi]                                               # (S, hd)
        v_h = kv[:, inner + lo:inner + hi]                               # (S, hd)

        # QK^T without materializing a K transpose: contract last dims.
        scores = lax.dot_general(q_h, k_h, (((1,), (1,)), ((), ())),
                                 preferred_element_type=jnp.float32)     # (tq, S)
        scores = scores + bias                                           # key mask, broadcast over rows

        # Numerically stable softmax along the key axis.
        scores = scores - jnp.max(scores, axis=-1, keepdims=True)
        p = jnp.exp(scores)
        p = p * pl.reciprocal(jnp.sum(p, axis=-1, keepdims=True), approx=True)

        ctx_parts.append(jnp.dot(p.astype(mdt), v_h,
                                 preferred_element_type=jnp.float32))    # (tq, hd) f32

    # Merged output projection: one (tq, inner) @ (inner, D) matmul, bias added once.
    ctx = jnp.concatenate(ctx_parts, axis=-1).astype(mdt)                # (tq, inner)
    out = jnp.dot(ctx, wo_ref[...],
                  preferred_element_type=jnp.float32) + bo_ref[...]      # (tq, D) f32
    o_ref[0] = out.astype(o_ref.dtype)


# ---------------------------------------------------------------------------
# Wrapper: packs parameters and launches the fused pallas_call.
# ---------------------------------------------------------------------------
def attention_forward(params, X, mask, *, num_head, head_dim,
                      matmul_dtype=jnp.bfloat16, q_block=512):
    B, S, D = X.shape
    inner = num_head * head_dim
    scale = 1.0 / math.sqrt(head_dim)

    # Fold the attention scale into the Q projection; cast weights/activations
    # to the matmul dtype once in the wrapper (biases stay f32, added to the
    # f32 accumulators inside the kernel).
    wq = (params["W_q_w"].astype(jnp.float32) * scale).astype(matmul_dtype)        # (D, inner)
    bq = (params["W_q_b"].astype(jnp.float32) * scale).reshape(1, inner)
    wkv = jnp.concatenate([params["W_k_w"], params["W_v_w"]], axis=1).astype(matmul_dtype)   # (D, 2*inner)
    bkv = jnp.concatenate([params["W_k_b"], params["W_v_b"]],
                          axis=0).reshape(1, 2 * inner).astype(jnp.float32)
    wo = params["ff_w"].astype(matmul_dtype)                                        # (inner, D)
    bo = params["ff_b"].reshape(1, D).astype(jnp.float32)

    # Additive mask bias, computed once: -1e6 * (1 - mask), shape (B, 1, S).
    bias = (-1000000.0 * (1.0 - mask.astype(jnp.float32))).reshape(B, 1, S)

    x = X.astype(matmul_dtype)

    tq = _pick_q_tile(S, q_block)
    nq = S // tq

    vmem_limit = int(min(
        max(_vmem_bytes_estimate(S, D, inner, tq, jnp.dtype(matmul_dtype).itemsize) + (4 << 20),
            16 << 20),
        64 << 20))

    kernel = functools.partial(_attention_kernel, num_head=num_head,
                               head_dim=head_dim, tq=tq)

    out = pl.pallas_call(
        kernel,
        out_shape=jax.ShapeDtypeStruct((B, S, D), jnp.float32),
        grid_spec=pltpu.PrefetchScalarGridSpec(
            num_scalar_prefetch=0,
            grid=(B, nq),
            in_specs=[
                pl.BlockSpec((1, S, D), lambda b, q: (b, 0, 0)),           # x (full seq, per batch)
                pl.BlockSpec((1, 1, S), lambda b, q: (b, 0, 0)),           # mask bias (per batch)
                pl.BlockSpec((D, inner), lambda b, q: (0, 0)),             # wq (resident)
                pl.BlockSpec((1, inner), lambda b, q: (0, 0)),             # bq
                pl.BlockSpec((D, 2 * inner), lambda b, q: (0, 0)),         # wkv (resident)
                pl.BlockSpec((1, 2 * inner), lambda b, q: (0, 0)),         # bkv
                pl.BlockSpec((inner, D), lambda b, q: (0, 0)),             # wo (resident)
                pl.BlockSpec((1, D), lambda b, q: (0, 0)),                 # bo
            ],
            out_specs=pl.BlockSpec((1, tq, D), lambda b, q: (b, q, 0)),    # lane-dense (tq, D) block
            scratch_shapes=[pltpu.VMEM((S, 2 * inner), matmul_dtype)],     # K/V, persistent per batch
        ),
        compiler_params=pltpu.CompilerParams(
            # batch axis is independent (megacore-shardable); the query-tile
            # axis carries the K/V scratch and must run in order.
            dimension_semantics=("parallel", "arbitrary"),
            vmem_limit_bytes=vmem_limit,
        ),
    )(x, bias, wq, bq, wkv, bkv, wo, bo)
    return out


# ---------------------------------------------------------------------------
# Deterministic parameter init (mimics nn.Linear uniform init, (in, out) layout)
# ---------------------------------------------------------------------------
def init_params(key, dim, num_head, head_dim):
    inner = num_head * head_dim
    ks = jax.random.split(key, 8)

    def uni(k, shape, fan_in):
        bound = 1.0 / math.sqrt(fan_in)
        return jax.random.uniform(k, shape, jnp.float32, -bound, bound)

    return {
        "W_q_w": uni(ks[0], (dim, inner), dim), "W_q_b": uni(ks[1], (inner,), dim),
        "W_k_w": uni(ks[2], (dim, inner), dim), "W_k_b": uni(ks[3], (inner,), dim),
        "W_v_w": uni(ks[4], (dim, inner), dim), "W_v_b": uni(ks[5], (inner,), dim),
        "ff_w":  uni(ks[6], (inner, dim), inner), "ff_b": uni(ks[7], (dim,), inner),
    }


# ---------------------------------------------------------------------------
# Pure-JAX reference (mirrors the PyTorch forward) for a numerical sanity check.
# ---------------------------------------------------------------------------
def _reference_forward(params, X, mask, *, num_head, head_dim):
    B, S, D = X.shape
    inner = num_head * head_dim
    q = X @ params["W_q_w"] + params["W_q_b"]
    k = X @ params["W_k_w"] + params["W_k_b"]
    v = X @ params["W_v_w"] + params["W_v_b"]

    def split(t):
        return t.reshape(B, S, num_head, head_dim).transpose(0, 2, 1, 3)

    q, k, v = split(q), split(k), split(v)
    dot = jnp.einsum("bhqd,bhkd->bhqk", q, k) / math.sqrt(head_dim)
    dot = dot - 1000000.0 * (1.0 - mask[:, None, None, :])
    attn = jax.nn.softmax(dot, axis=-1)
    ctx = jnp.einsum("bhqk,bhkd->bhqd", attn, v)
    ctx = ctx.transpose(0, 2, 1, 3).reshape(B, S, inner)
    return ctx @ params["ff_w"] + params["ff_b"]


if __name__ == "__main__":
    # config: transformer_dim=32, num_head=2, head_dim=16, attn_type='softmax',
    # attention_dropout=0.0 (eval).  NOTE: at these toy shapes every vreg is
    # mostly padding and the kernel is per-step-overhead dominated; the design
    # targets realistic S / D where the bf16 path and query tiling matter.
    B, S, dim, num_head, head_dim = 2, 8, 32, 2, 16

    key = jax.random.PRNGKey(0)
    k_param, k_x = jax.random.split(key)

    params = init_params(k_param, dim, num_head, head_dim)
    X = jax.random.normal(k_x, (B, S, dim), jnp.float32)
    # mask: last two positions of batch 1 are padding
    mask = jnp.ones((B, S), jnp.float32).at[1, -2:].set(0.0)

    # Default fast path (bf16 MXU inputs, f32 accumulation).
    out = attention_forward(params, X, mask, num_head=num_head, head_dim=head_dim)
    jax.block_until_ready(out)
    assert out.shape == (B, S, dim)

    # Numerical sanity check of the f32 path against the pure-JAX reference.
    out_f32 = attention_forward(params, X, mask, num_head=num_head,
                                head_dim=head_dim, matmul_dtype=jnp.float32)
    ref = _reference_forward(params, X, mask, num_head=num_head, head_dim=head_dim)
    max_err = float(jnp.max(jnp.abs(out_f32 - ref)))
    assert max_err < 3e-2, f"kernel/reference mismatch: max abs err {max_err}"

    print("KERNEL_OK")
</pallas_src>

<mosaic_0001>
module attributes {stable_mosaic.version = 11 : i64} {
  func.func @_attention_kernel(%arg0: i32, %arg1: i32, %arg2: memref<1x8x32xbf16, #tpu.memory_space<vmem>>, %arg3: memref<1x1x8xf32, #tpu.memory_space<vmem>>, %arg4: memref<32x32xbf16, #tpu.memory_space<vmem>>, %arg5: memref<1x32xf32, #tpu.memory_space<vmem>>, %arg6: memref<32x64xbf16, #tpu.memory_space<vmem>>, %arg7: memref<1x64xf32, #tpu.memory_space<vmem>>, %arg8: memref<32x32xbf16, #tpu.memory_space<vmem>>, %arg9: memref<1x32xf32, #tpu.memory_space<vmem>>, %arg10: memref<1x8x32xf32, #tpu.memory_space<vmem>>, %arg11: memref<8x64xbf16, #tpu.memory_space<vmem>>) attributes {dimension_semantics = [#tpu.dimension_semantics<parallel>, #tpu.dimension_semantics<arbitrary>], iteration_bounds = array<i64: 2, 1>, scalar_prefetch = 0 : i64, scratch_operands = 1 : i64, tpu.core_type = #tpu.core_type<tc>, window_params = [{transform_indices = @transform_0, window_bounds = array<i64: 1, 8, 32>}, {transform_indices = @transform_1, window_bounds = array<i64: 1, 1, 8>}, {pipeline_mode = #tpu.pipeline_mode<synchronous>, transform_indices = @transform_2, window_bounds = array<i64: 32, 32>}, {pipeline_mode = #tpu.pipeline_mode<synchronous>, transform_indices = @transform_3, window_bounds = array<i64: 1, 32>}, {pipeline_mode = #tpu.pipeline_mode<synchronous>, transform_indices = @transform_4, window_bounds = array<i64: 32, 64>}, {pipeline_mode = #tpu.pipeline_mode<synchronous>, transform_indices = @transform_5, window_bounds = array<i64: 1, 64>}, {pipeline_mode = #tpu.pipeline_mode<synchronous>, transform_indices = @transform_6, window_bounds = array<i64: 32, 32>}, {pipeline_mode = #tpu.pipeline_mode<synchronous>, transform_indices = @transform_7, window_bounds = array<i64: 1, 32>}, {transform_indices = @transform_8, window_bounds = array<i64: 1, 8, 32>}]} {
    %c0_i32 = arith.constant 0 : i32
    %0 = arith.cmpi eq, %arg1, %c0_i32 : i32
    %1 = arith.extui %0 : i1 to i32
    %c0_i32_0 = arith.constant 0 : i32
    %2 = arith.cmpi ne, %1, %c0_i32_0 : i32
    scf.if %2 {
      %c0_27 = arith.constant 0 : index
      %c0_28 = arith.constant 0 : index
      %c0_29 = arith.constant 0 : index
      %63 = vector.load %arg2[%c0_27, %c0_28, %c0_29] : memref<1x8x32xbf16, #tpu.memory_space<vmem>>, vector<1x8x32xbf16>
      %64 = vector.shape_cast %63 : vector<1x8x32xbf16> to vector<8x32xbf16>
      %c0_30 = arith.constant 0 : index
      %c0_31 = arith.constant 0 : index
      %65 = vector.load %arg6[%c0_30, %c0_31] : memref<32x64xbf16, #tpu.memory_space<vmem>>, vector<32x64xbf16>
      %cst_32 = arith.constant dense<0.000000e+00> : vector<8x64xf32>
      %66 = tpu.matmul %64, %65, %cst_32 {dimension_numbers = #tpu.dot_dimension_numbers<[1], [0], [0], [1], [0, 0, 1, 1], [], []>} : vector<8x32xbf16>, vector<32x64xbf16>, vector<8x64xf32> -> vector<8x64xf32>
      %c0_33 = arith.constant 0 : index
      %c0_34 = arith.constant 0 : index
      %67 = vector.load %arg7[%c0_33, %c0_34] : memref<1x64xf32, #tpu.memory_space<vmem>>, vector<1x64xf32>
      %68 = vector.broadcast %67 : vector<1x64xf32> to vector<8x64xf32>
      %69 = arith.addf %66, %68 : vector<8x64xf32>
      %70 = arith.truncf %69 : vector<8x64xf32> to vector<8x64xbf16>
      %c0_35 = arith.constant 0 : index
      %c0_36 = arith.constant 0 : index
      %71 = vector.load %arg11[%c0_35, %c0_36] : memref<8x64xbf16, #tpu.memory_space<vmem>>, vector<8x64xbf16>
      tpu.vector_store %arg11[%c0_35, %c0_36], %70 {strides = array<i32>} : memref<8x64xbf16, #tpu.memory_space<vmem>>, vector<8x64xbf16>,
    } else {
    }
    %c8_i32 = arith.constant 8 : i32
    %3 = arith.muli %arg1, %c8_i32 : i32
    %4 = tpu.assume_multiple %3, 8 : i32
    %c0 = arith.constant 0 : index
    %5 = arith.index_cast %4 : i32 to index
    %c0_1 = arith.constant 0 : index
    %6 = vector.load %arg2[%c0, %5, %c0_1] : memref<1x8x32xbf16, #tpu.memory_space<vmem>>, vector<1x8x32xbf16>
    %7 = vector.shape_cast %6 : vector<1x8x32xbf16> to vector<8x32xbf16>
    %c0_2 = arith.constant 0 : index
    %c0_3 = arith.constant 0 : index
    %8 = vector.load %arg4[%c0_2, %c0_3] : memref<32x32xbf16, #tpu.memory_space<vmem>>, vector<32x32xbf16>
    %cst = arith.constant dense<0.000000e+00> : vector<8x32xf32>
    %9 = tpu.matmul %7, %8, %cst {dimension_numbers = #tpu.dot_dimension_numbers<[1], [0], [0], [1], [0, 0, 1, 1], [], []>} : vector<8x32xbf16>, vector<32x32xbf16>, vector<8x32xf32> -> vector<8x32xf32>
    %c0_4 = arith.constant 0 : index
    %c0_5 = arith.constant 0 : index
    %10 = vector.load %arg5[%c0_4, %c0_5] : memref<1x32xf32, #tpu.memory_space<vmem>>, vector<1x32xf32>
    %11 = vector.broadcast %10 : vector<1x32xf32> to vector<8x32xf32>
    %12 = arith.addf %9, %11 : vector<8x32xf32>
    %13 = arith.truncf %12 : vector<8x32xf32> to vector<8x32xbf16>
    %c0_6 = arith.constant 0 : index
    %c0_7 = arith.constant 0 : index
    %14 = vector.load %arg11[%c0_6, %c0_7] : memref<8x64xbf16, #tpu.memory_space<vmem>>, vector<8x64xbf16>
    %c0_8 = arith.constant 0 : index
    %c0_9 = arith.constant 0 : index
    %c0_10 = arith.constant 0 : index
    %15 = vector.load %arg3[%c0_8, %c0_9, %c0_10] : memref<1x1x8xf32, #tpu.memory_space<vmem>>, vector<1x1x8xf32>
    %16 = vector.shape_cast %15 : vector<1x1x8xf32> to vector<1x8xf32>
    %17 = vector.extract_strided_slice %13 {offsets = [0, 0], sizes = [8, 16], strides = [1, 1]} : vector<8x32xbf16> to vector<8x16xbf16>
    %18 = vector.extract_strided_slice %14 {offsets = [0, 0], sizes = [8, 16], strides = [1, 1]} : vector<8x64xbf16> to vector<8x16xbf16>
    %19 = vector.extract_strided_slice %14 {offsets = [0, 32], sizes = [8, 16], strides = [1, 1]} : vector<8x64xbf16> to vector<8x16xbf16>
    %cst_11 = arith.constant dense<0.000000e+00> : vector<8x8xf32>
    %20 = tpu.matmul %17, %18, %cst_11 {dimension_numbers = #tpu.dot_dimension_numbers<[1], [1], [0], [0], [0, 0, 1, 0], [], []>} : vector<8x16xbf16>, vector<8x16xbf16>, vector<8x8xf32> -> vector<8x8xf32>
    %21 = vector.broadcast %16 : vector<1x8xf32> to vector<8x8xf32>
    %22 = arith.addf %20, %21 : vector<8x8xf32>
    %cst_12 = arith.constant dense<0xFF800000> : vector<8xf32>
    %23 = vector.multi_reduction <maximumf>, %22, %cst_12 [1] : vector<8x8xf32> to vector<8xf32>
    %24 = vector.shape_cast %23 : vector<8xf32> to vector<8x1xf32>
    %25 = vector.broadcast %24 : vector<8x1xf32> to vector<8x8xf32>
    %26 = arith.subf %22, %25 : vector<8x8xf32>
    %27 = math.exp %26 : vector<8x8xf32>
    %cst_13 = arith.constant dense<0.000000e+00> : vector<8xf32>
    %28 = vector.multi_reduction <add>, %27, %cst_13 [1] : vector<8x8xf32> to vector<8xf32>
    %29 = vector.shape_cast %28 : vector<8xf32> to vector<8x1xf32>
    %30 = tpu.reciprocal %29 {approx = true} : vector<8x1xf32> -> vector<8x1xf32>
    %31 = vector.broadcast %30 : vector<8x1xf32> to vector<8x8xf32>
    %32 = arith.mulf %27, %31 : vector<8x8xf32>
    %33 = arith.truncf %32 : vector<8x8xf32> to vector<8x8xbf16>
    %cst_14 = arith.constant dense<0.000000e+00> : vector<8x16xf32>
    %34 = tpu.matmul %33, %19, %cst_14 {dimension_numbers = #tpu.dot_dimension_numbers<[1], [0], [0], [1], [0, 0, 1, 1], [], []>} : vector<8x8xbf16>, vector<8x16xbf16>, vector<8x16xf32> -> vector<8x16xf32>
    %35 = vector.extract_strided_slice %13 {offsets = [0, 16], sizes = [8, 16], strides = [1, 1]} : vector<8x32xbf16> to vector<8x16xbf16>
    %36 = vector.extract_strided_slice %14 {offsets = [0, 16], sizes = [8, 16], strides = [1, 1]} : vector<8x64xbf16> to vector<8x16xbf16>
    %37 = vector.extract_strided_slice %14 {offsets = [0, 48], sizes = [8, 16], strides = [1, 1]} : vector<8x64xbf16> to vector<8x16xbf16>
    %cst_15 = arith.constant dense<0.000000e+00> : vector<8x8xf32>
    %38 = tpu.matmul %35, %36, %cst_15 {dimension_numbers = #tpu.dot_dimension_numbers<[1], [1], [0], [0], [0, 0, 1, 0], [], []>} : vector<8x16xbf16>, vector<8x16xbf16>, vector<8x8xf32> -> vector<8x8xf32>
    %39 = vector.broadcast %16 : vector<1x8xf32> to vector<8x8xf32>
    %40 = arith.addf %38, %39 : vector<8x8xf32>
    %cst_16 = arith.constant dense<0xFF800000> : vector<8xf32>
    %41 = vector.multi_reduction <maximumf>, %40, %cst_16 [1] : vector<8x8xf32> to vector<8xf32>
    %42 = vector.shape_cast %41 : vector<8xf32> to vector<8x1xf32>
    %43 = vector.broadcast %42 : vector<8x1xf32> to vector<8x8xf32>
    %44 = arith.subf %40, %43 : vector<8x8xf32>
    %45 = math.exp %44 : vector<8x8xf32>
    %cst_17 = arith.constant dense<0.000000e+00> : vector<8xf32>
    %46 = vector.multi_reduction <add>, %45, %cst_17 [1] : vector<8x8xf32> to vector<8xf32>
    %47 = vector.shape_cast %46 : vector<8xf32> to vector<8x1xf32>
    %48 = tpu.reciprocal %47 {approx = true} : vector<8x1xf32> -> vector<8x1xf32>
    %49 = vector.broadcast %48 : vector<8x1xf32> to vector<8x8xf32>
    %50 = arith.mulf %45, %49 : vector<8x8xf32>
    %51 = arith.truncf %50 : vector<8x8xf32> to vector<8x8xbf16>
    %cst_18 = arith.constant dense<0.000000e+00> : vector<8x16xf32>
    %52 = tpu.matmul %51, %37, %cst_18 {dimension_numbers = #tpu.dot_dimension_numbers<[1], [0], [0], [1], [0, 0, 1, 1], [], []>} : vector<8x8xbf16>, vector<8x16xbf16>, vector<8x16xf32> -> vector<8x16xf32>
    %53 = tpu.concatenate %34, %52 in 1 : vector<8x16xf32>, vector<8x16xf32> -> vector<8x32xf32>
    %54 = arith.truncf %53 : vector<8x32xf32> to vector<8x32xbf16>
    %c0_19 = arith.constant 0 : index
    %c0_20 = arith.constant 0 : index
    %55 = vector.load %arg8[%c0_19, %c0_20] : memref<32x32xbf16, #tpu.memory_space<vmem>>, vector<32x32xbf16>
    %cst_21 = arith.constant dense<0.000000e+00> : vector<8x32xf32>
    %56 = tpu.matmul %54, %55, %cst_21 {dimension_numbers = #tpu.dot_dimension_numbers<[1], [0], [0], [1], [0, 0, 1, 1], [], []>} : vector<8x32xbf16>, vector<32x32xbf16>, vector<8x32xf32> -> vector<8x32xf32>
    %c0_22 = arith.constant 0 : index
    %c0_23 = arith.constant 0 : index
    %57 = vector.load %arg9[%c0_22, %c0_23] : memref<1x32xf32, #tpu.memory_space<vmem>>, vector<1x32xf32>
    %58 = vector.broadcast %57 : vector<1x32xf32> to vector<8x32xf32>
    %59 = arith.addf %56, %58 : vector<8x32xf32>
    %c0_24 = arith.constant 0 : index
    %c0_25 = arith.constant 0 : index
    %c0_26 = arith.constant 0 : index
    %60 = vector.load %arg10[%c0_24, %c0_25, %c0_26] : memref<1x8x32xf32, #tpu.memory_space<vmem>>, vector<1x8x32xf32>
    %61 = vector.shape_cast %60 : vector<1x8x32xf32> to vector<8x32xf32>
    %62 = vector.shape_cast %59 : vector<8x32xf32> to vector<1x8x32xf32>
    tpu.vector_store %arg10[%c0_24, %c0_25, %c0_26], %62 {strides = array<i32>} : memref<1x8x32xf32, #tpu.memory_space<vmem>>, vector<1x8x32xf32>,
    return
  }
  func.func @transform_0(%arg0: i32, %arg1: i32) -> (i32, i32, i32) {
    %c0_i32 = arith.constant 0 : i32
    %c0_i32_0 = arith.constant 0 : i32
    %c0_i32_1 = arith.constant 0 : i32
    return %arg0, %c0_i32, %c0_i32_0 : i32, i32, i32
  }
  func.func @transform_1(%arg0: i32, %arg1: i32) -> (i32, i32, i32) {
    %c0_i32 = arith.constant 0 : i32
    %c0_i32_0 = arith.constant 0 : i32
    %c0_i32_1 = arith.constant 0 : i32
    return %arg0, %c0_i32, %c0_i32_0 : i32, i32, i32
  }
  func.func @transform_2(%arg0: i32, %arg1: i32) -> (i32, i32) {
    %c0_i32 = arith.constant 0 : i32
    %c0_i32_0 = arith.constant 0 : i32
    %c0_i32_1 = arith.constant 0 : i32
    return %c0_i32, %c0_i32_0 : i32, i32
  }
  func.func @transform_3(%arg0: i32, %arg1: i32) -> (i32, i32) {
    %c0_i32 = arith.constant 0 : i32
    %c0_i32_0 = arith.constant 0 : i32
    %c0_i32_1 = arith.constant 0 : i32
    return %c0_i32, %c0_i32_0 : i32, i32
  }
  func.func @transform_4(%arg0: i32, %arg1: i32) -> (i32, i32) {
    %c0_i32 = arith.constant 0 : i32
    %c0_i32_0 = arith.constant 0 : i32
    %c0_i32_1 = arith.constant 0 : i32
    return %c0_i32, %c0_i32_0 : i32, i32
  }
  func.func @transform_5(%arg0: i32, %arg1: i32) -> (i32, i32) {
    %c0_i32 = arith.constant 0 : i32
    %c0_i32_0 = arith.constant 0 : i32
    %c0_i32_1 = arith.constant 0 : i32
    return %c0_i32, %c0_i32_0 : i32, i32
  }
  func.func @transform_6(%arg0: i32, %arg1: i32) -> (i32, i32) {
    %c0_i32 = arith.constant 0 : i32
    %c0_i32_0 = arith.constant 0 : i32
    %c0_i32_1 = arith.constant 0 : i32
    return %c0_i32, %c0_i32_0 : i32, i32
  }
  func.func @transform_7(%arg0: i32, %arg1: i32) -> (i32, i32) {
    %c0_i32 = arith.constant 0 : i32
    %c0_i32_0 = arith.constant 0 : i32
    %c0_i32_1 = arith.constant 0 : i32
    return %c0_i32, %c0_i32_0 : i32, i32
  }
  func.func @transform_8(%arg0: i32, %arg1: i32) -> (i32, i32, i32) {
    %c0_i32 = arith.constant 0 : i32
    %c0_i32_0 = arith.constant 0 : i32
    return %arg0, %arg1, %c0_i32 : i32, i32, i32
  }
}

</mosaic_0001>

<bundles_post_ra>
// kernel: tpu_custom_call.1
= control target key start
LH: loop header
LB: loop body
LE: loop exit
PB: predicated region body
PF: predicated region fallthrough
CT: control target
= control target key end

     0   :  { %s1705_s0 = inlined_call_operand.hbm [shape: bf16[2,8,32], index: 0, kind: input, shape index: {}]   ;;  %s1706_s1 = inlined_call_operand.vmem [shape: f32[2,1,8], index: 1, kind: input, shape index: {}]   ;;  %s1707_s2 = inlined_call_operand.hbm [shape: bf16[32,32], index: 2, kind: input, shape index: {}]   ;;  %s1708_s3 = inlined_call_operand.vmem [shape: f32[1,32], index: 3, kind: input, shape index: {}]   ;;  %s1709_s4 = inlined_call_operand.hbm [shape: bf16[32,64], index: 4, kind: input, shape index: {}]   ;;  %s1710_s5 = inlined_call_operand.vmem [shape: f32[1,64], index: 5, kind: input, shape index: {}]   ;;  %s1711_s6 = inlined_call_operand.vmem [shape: bf16[32,32], index: 6, kind: input, shape index: {}]   ;;  %s1712_s7 = inlined_call_operand.vmem [shape: f32[1,32], index: 7, kind: input, shape index: {}]   ;;  %s1713_s8 = inlined_call_operand.hbm [shape: f32[2,8,32], index: 8, kind: output, shape index: {}]  }
   0x1   :  { %1721 = sst [smem:[#allocation15_spill]] %s1713_s8 }
   0x2   :  { %13 = vsyncpa [#allocation4], 0 }
   0x3   :  { %15 = vsyncpa [#allocation4 + $0x1], 0 }
   0x4   :  { %16 = vsyncpa [#allocation7], 0 }
   0x5   :  { %17 = vsyncpa [#allocation5], 0 }
   0x6   :  { %19 = vsyncpa [#allocation5 + $0x1], 0  ;;  %s1393_s27 = smov 0   ;;  %s1395_s28 = smov 0  }
   0x7   :  { %s1397_s29 = smov 0   ;;  %s1399_s30 = smov 0  }
   0x8   :  { %s1401_s9 = smov 0   ;;  %s1403_s10 = smov 0  }
   0x9 LB: > { %1722 = sst [smem:[#allocation13_spill]] %s1314_s27  ;;  %s956_s11 = sadd.s32 4294967295, %s1334_s10   ;;  %s1334_s10 = sphi %s1403_s10, %s25_s10   ;;  %s1330_s9 = sphi %s1401_s9, %s1744_s9   ;;  %s1326_s30 = sphi %s1399_s30, %s1743_s30   ;;  %s1322_s29 = sphi %s1397_s29, %s1742_s29   ;;  %s1318_s28 = sphi %s1395_s28, %s1741_s28   ;;  %s1314_s27 = sphi %s1393_s27, %s1740_s27  }
   0xa   : > { %s957_s12 = sadd.s32 4294967294, %s1334_s10   ;;  %p57_p0 = scmp.ne.s32.totalorder %s1318_s28, %s1314_s27 }
   0xb   : > { %p1427_p1 = scmp.eq.s32.totalorder %s956_s11, 0  ;;  %p1431_p2 = scmp.eq.s32.totalorder %s956_s11, 1 }
   0xc   : > { %p241_p3 = scmp.eq.s32.totalorder %s957_s12, 1  ;;  %p958_p5 = scmp.ge.s32.totalorder %s1334_s10, 1 }
   0xd   : > { %s1723_s13 = scalar_select %p1427_p1, 1, 0 }
   0xe   : > { %p1437_p4 = por %p1427_p1, %p57_p0  ;;  %p1442_p6 = por %p241_p3, %p57_p0 }
   0xf   : > { %p248_p7 = scmp.lt.s32.totalorder %s1334_s10, 3  ;;  %s1336_s18 = smov [#allocation6]  }
  0x10   : > { %s1725_s15 = scalar_select %p1437_p4, 1, 0 }
  0x11   : > { %s1726_s16 = scalar_select %p1442_p6, 1, 0 }
  0x12   : > { %p1447_p8 = pnand %p958_p5, %p248_p7  ;;  %s260_s19 = sshll.u32 %s1336_s18, 4  ;;  %s1451_s19 = int_to_ptr.vmem [resolvable:$true] %s260_s19 }
  0x13   : > { %1727 = sst [smem:[#allocation14_spill]] %s1726_s16  ;;  %s1337_s21 = smov [#allocation8]  }
  0x14   : > { %p1068_p9 = pneg %p1447_p8  ;;  %s276_s22 = sshll.u32 %s1337_s21, 4  ;;  %s1462_s22 = int_to_ptr.vmem [resolvable:$true] %s276_s22 }
  0x15   : > { %s1162_s25 = scalar_lea.hbm %s1707_s2, 256 }
  0x16   : > { %p1458_p11 = pnand %p1068_p9, %p1427_p1  ;;  %p1163_p12 = scmp.ne.s32.totalorder %s1707_s2, %s1162_s25 }
  0x17   : > { %p1169_p5 = scmp.lt.u32.totalorder %s1162_s25, %s1707_s2 }
  0x18   : > { %p1164_p13 = pneg %p1458_p11 }
  0x1a   : > { %p1165_p0 = pnand %p1164_p13, %p1163_p12 }
  0x1c   : > { %p1166_p3 = pneg %p1165_p0 }
  0x1e   : > { %p1171_p7 = pnand %p1169_p5, %p1166_p3 }
  0x20   : > { %1174 = shalt.err (!%p1171_p7)
}
  0x21   : > { %s1175_s21 = scalar_lea.vmem %s1451_s19, 256  ;;  %p1183_p1 = scmp.lt.s32.totalorder %s1451_s19, %s1451_s19 }
  0x22   : > { %p1176_p9 = scmp.ne.s32.totalorder %s1451_s19, %s1175_s21  ;;  %p1184_p12 = scmp.lt.s32.totalorder %s1175_s21, %s1175_s21 }
  0x24   : > { %p1178_p10 = pnand %p1176_p9, %p1164_p13  ;;  %p1185_p0 = por %p1184_p12, %p1183_p1 }
  0x26   : > { %p1179_p6 = pneg %p1178_p10 }
  0x28   : > { %p1186_p4 = pnand %p1185_p0, %p1179_p6 }
  0x2a   : > { %1189 = shalt.err (!%p1186_p4)
}
  0x2b   : > { %s1338_s23 = smov 64   ;;  %s1339_s24 = smov 4  }
  0x2c   : > { %1071 = dma.hbm_to_vmem [thread:$0]  (!%p1458_p11), %s1707_s2, 256, %s1451_s19, [#allocation7], %s1338_s23, %s1338_s23, %s1339_s24  }
  0x2d   : > { %s1190_s18 = scalar_lea.hbm %s1709_s4, 256 }
  0x2e   : > { %p1191_p1 = scmp.ne.s32.totalorder %s1709_s4, %s1190_s18  ;;  %p1197_p10 = scmp.lt.u32.totalorder %s1190_s18, %s1709_s4 }
  0x30   : > { %p1193_p4 = pnand %p1191_p1, %p1164_p13 }
  0x32   : > { %p1194_p6 = pneg %p1193_p4 }
  0x34   : > { %p1199_p3 = pnand %p1197_p10, %p1194_p6 }
  0x36   : > { %1202 = shalt.err (!%p1199_p3)
}
  0x37   : > { %s1203_s19 = scalar_lea.vmem %s1462_s22, 256  ;;  %p1211_p12 = scmp.lt.s32.totalorder %s1462_s22, %s1462_s22 }
  0x38   : > { %p1204_p5 = scmp.ne.s32.totalorder %s1462_s22, %s1203_s19  ;;  %p1212_p0 = scmp.lt.s32.totalorder %s1203_s19, %s1203_s19 }
  0x3a   : > { %p1206_p7 = pnand %p1204_p5, %p1164_p13  ;;  %p1213_p1 = por %p1212_p0, %p1211_p12 }
  0x3c   : > { %p1207_p9 = pneg %p1206_p7 }
  0x3e   : > { %p1214_p4 = pnand %p1213_p1, %p1207_p9 }
  0x40   : > { %1217 = shalt.err (!%p1214_p4)
}
  0x41   : > { %1074 = dma.hbm_to_vmem [thread:$0]  (!%p1458_p11), %s1709_s4, 256, %s1462_s22, [#allocation7], %s1338_s23, %s1338_s23, %s1339_s24  }
  0x42   : > { %s37_s16 = sadd.s32 1, %s1330_s9  ;;  %s44_s25 = sadd.s32 1, %s1322_s29 }
  0x43   : > { %p39_p13 = scmp.ge.s32.totalorder %s37_s16, 2  ;;  %p51_p6 = scmp.ne.s32.totalorder %s1322_s29, %s1318_s28 }
  0x44   : > { %p52_p10 = scmp.eq.s32.totalorder %s1334_s10, 0  ;;  %p1085_p3 = scmp.lt.s32.totalorder %s1334_s10, 2 }
  0x45   : > { %s1746_s16 = smov (%p39_p13, %s37_s16), 0  ;;  %p1526_p7 = por %p1431_p2, %p51_p6 }
  0x46   : > { %p53_p5 = por %p52_p10, %p51_p6  ;;  %s41_s26 = ssub.s32 %s1330_s9, %s1746_s16 }
  0x47   : > { %s1730_s20 = scalar_select %p1526_p7, 1, 0 }
  0x48   : > { %s299_s11 = sand.u32 1, %s1322_s29   ;;  %p42_p9 = scmp.eq.s32.totalorder %s41_s26, 0 }
  0x49   : > { %s962_s22 = sshll.u32 %s299_s11, 2  ;;  %s963_s23 = sshll.u32 %s1330_s9, 6 }
  0x4a   : > { %s1535_s24 = scalar_select %p42_p9, %s1322_s29, %s44_s25  }
  0x4b   : > { %s1540_s21 = scalar_lea.hbm %s1705_s0, %s963_s23  ;;  %s303_s14 = scalar_lea.vmem [#allocation3], %s962_s22 }
  0x4c   : > { %s310_s19 = sshll.u32 %s303_s14, 4  ;;  %p1544_p2 = pnand %p1085_p3, %p53_p5  ;;  %s1548_s19 = int_to_ptr.vmem [resolvable:$true] %s310_s19 }
  0x4d   : > { %s300_s27 = scalar_lea.sflag [#allocation4], %s299_s11  ;;  %s1218_s25 = scalar_lea.hbm %s1540_s21, 64 }
  0x4e   : > { %p1219_p11 = scmp.ne.s32.totalorder %s1540_s21, %s1218_s25  ;;  %p1220_p12 = pneg %p1544_p2 }
  0x4f   : > { %s1223_s23 = scalar_lea.hbm %s1705_s0, 128  ;;  %p1224_p4 = scmp.lt.u32.totalorder %s1540_s21, %s1705_s0 }
  0x50   : > { %p1221_p0 = pnand %p1220_p12, %p1219_p11  ;;  %p1225_p13 = scmp.lt.u32.totalorder %s1223_s23, %s1218_s25 }
  0x51   : > { %p1227_p10 = scmp.lt.u32.totalorder %s1218_s25, %s1540_s21 }
  0x52   : > { %p1222_p1 = pneg %p1221_p0  ;;  %p1226_p6 = por %p1225_p13, %p1224_p4 }
  0x54   : > { %p1228_p3 = por %p1227_p10, %p1226_p6 }
  0x56   : > { %p1229_p5 = pnand %p1228_p3, %p1222_p1 }
  0x58   : > { %1232 = shalt.err (!%p1229_p5)
}
  0x59   : > { %s1233_s11 = scalar_lea.vmem %s1548_s19, 64  ;;  %s1340_s14 = smov [#allocation3]  }
  0x5a   : > { %p1234_p9 = scmp.ne.s32.totalorder %s1548_s19, %s1233_s11  ;;  %s1238_s26 = sshll.u32 %s1340_s14, 4  ;;  %s1239_s26 = int_to_ptr.vmem [resolvable:$false] %s1238_s26 }
  0x5b   : > { %s1240_s22 = scalar_lea.vmem %s1239_s26, 128  ;;  %p1241_p7 = scmp.lt.s32.totalorder %s1548_s19, %s1239_s26 }
  0x5c   : > { %p1236_p11 = pnand %p1234_p9, %p1220_p12  ;;  %p1242_p4 = scmp.lt.s32.totalorder %s1240_s22, %s1233_s11 }
  0x5e   : > { %p1237_p0 = pneg %p1236_p11  ;;  %p1243_p13 = por %p1242_p4, %p1241_p7 }
  0x60   : > { %p1244_p6 = pnand %p1243_p13, %p1237_p0 }
  0x62   : > { %1247 = shalt.err (!%p1244_p6)
}
  0x63   : > { %1078 = dma.hbm_to_vmem [thread:$0]  (!%p1544_p2), %s1540_s21, 64, %s1548_s19, %s300_s27  }
  0x64   : > { %325 = sbr.rel (%p1447_p8) target bundleno = 1558 (0x616), region = 52  ;;  %s1578_s25 = sand.u32 (!%p1447_p8), 1, %s1318_s28  }
  0x65   : > { %s965_s23 = sshll.u32 (!%p1447_p8), %s1578_s25, 2  ;;  %s328_s12 = scalar_lea.sflag (!%p1447_p8), [#allocation4], %s1578_s25 }
  0x66   : > { %s331_s18 = scalar_lea.vmem (!%p1447_p8), [#allocation3], %s965_s23  ;;  %p1732_p7 = scmp.ne.s32.totalorder (!%p1447_p8), %s1725_s15, 0 }
  0x6b   : > { %1301 = dma.done.wait (%p1732_p7), %s328_s12, 64  }
  0x6c   : > { %1303 = vsyncadd (%p1732_p7), %s328_s12, 4294967232  ;;  %p1733_p12 = scmp.ne.s32.totalorder %s1723_s13, 0 }
  0x6e   : > { %1305 = dma.done.wait (%p1733_p12), [#allocation7], 512  }
  0x6f   : > { %1307 = vsyncadd (%p1733_p12), [#allocation7], 4294966784  ;;  %v1341_v0 = vmov 0.0   ;;  %vm1342_vm0 = vmmov 0   ;;  %v1147_v1 = vld [vmem:[#allocation8] sm:$0xff]   ;;  %v1148_v2 = vld [vmem:[#allocation8 + $0x8] sm:$0xff]  }
  0x70   : > { %1008 = vmatprep.subr.bf16.mxu0 %v1341_v0  ;;  %1012 = vmatprep.mubr.msk.bf16.mxu0 %vm1342_vm0, %v1341_v0  ;;  %v1149_v3 = vld [vmem:[#allocation6] sm:$0xff]   ;;  %v1150_v4 = vld [vmem:[#allocation6 + $0x8] sm:$0xff]   ;;  %v383_v5 = vld [vmem:[%s331_s18] sm:$0xf]  ;;  %vm407_vm1 = vcmask 261120   ;;  %vm452_vm2 = vcmask 519168  }
  0x71   : > { %1016 = vmatprep.subr.bf16.mxu1 %v1341_v0  ;;  %1020 = vmatprep.mubr.msk.bf16.mxu1 %vm1342_vm0, %v1341_v0  ;;  %v459_v6 = vld [vmem:[%s331_s18] sm:$0xf]  ;;  %v969_v7 = vld [vmem:[%s1710_s5] ss:$0 sm:$0xff]  ;;  %vm536_vm3 = vcmask 130048   ;;  %s1343_s19 = smov 112  }
  0x72   : > { %1009 = vmatpush3.bf16.msra.mxu0 %v1147_v1  ;;  %1017 = vmatpush3.bf16.msra.mxu1 %v1149_v3  ;;  %v973_v18 = vld [vmem:[%s1708_s3] ss:$0 sm:$0xff]  ;;  %p375_p8 = scmp.lt.s32.totalorder %s1326_s30, 1  ;;  %vm583_vm4 = vcmask 64512   ;;  %s1344_s26 = smov 96   ;;  %vm604_vm5 = vcmask 1043456  }
  0x73   : > { %1010 = vmatprep.subr.bf16.mxu0 %v1341_v0  ;;  %1018 = vmatprep.subr.bf16.mxu1 %v1341_v0  ;;  %s1345_s22 = smov 80   ;;  %v1152_v62 = vld [vmem:[%s1711_s6] sm:$0xff]   ;;  %s1346_s15 = smov 16  }
  0x74   : > { %s376_s8 = scalar_select %p375_p8, %s1326_s30, 1 }
  0x75   : > { %s968_s17 = sshll.u32 %s1578_s25, 3  ;;  %p1735_p1 = scmp.ne.s32.totalorder %s1730_s20, 0 }
  0x76   : > { %1011 = vmatpush3.bf16.msra.mxu0 %v1148_v2  ;;  %1019 = vmatpush3.bf16.msra.mxu1 %v1150_v4  ;;  %s377_s14 = scalar_lea.vmem %s1706_s1, %s376_s8  ;;  %v1153_v4 = vld [vmem:[%s1711_s6 + $0x8] sm:$0xff]   ;;  %s988_s8 = sshll.u32 %s1326_s30, 7 }
  0x77   : > { %1024 = vmatprep.subr.bf16.mxu0 %v1341_v0  ;;  %1030 = vmatprep.subr.bf16.mxu1 %v1341_v0  ;;  %v977_v27 = vld [vmem:[%s377_s14] ss:$0 sm:$0xff]  ;;  %s374_s27 = scalar_lea.vmem [#allocation9], %s968_s17  ;;  %s833_s30 = scalar_lea.sflag [#allocation5], %s1578_s25 }
  0x78   : > { %s847_s11 = sshll.u32 %s374_s27, 4  ;;  %s1347_s18 = smov [#allocation9]   ;;  %s1657_s11 = int_to_ptr.vmem [resolvable:$true] %s847_s11 }
  0x79   : > { %1013 = vmatmul.mubr.msk.bf16.vlgmr.msra.gmra.mrb[0].mxu0 %vm407_vm1, %v383_v5  ;;  %1021 = vmatmul.mubr.msk.bf16.vlgmr.msra.gmra.mrb[0].mxu1 %vm407_vm1, %v459_v6  ;;  %s1248_s12 = scalar_lea.vmem %s1657_s11, 128  ;;  %s1252_s13 = sshll.u32 %s1347_s18, 4  ;;  %s1253_s13 = int_to_ptr.vmem [resolvable:$false] %s1252_s13 }
  0x7a   : > { %1026 = vmatprep.mubr.msk.bf16.mxu0 %vm1342_vm0, %v1341_v0  ;;  %1032 = vmatprep.mubr.msk.bf16.mxu1 %vm1342_vm0, %v1341_v0  ;;  %p1249_p2 = scmp.ne.s32.totalorder %s1657_s11, %s1248_s12  ;;  %p1255_p5 = scmp.lt.s32.totalorder %s1657_s11, %s1253_s13 }
  0x7c   : > { %p1250_p10 = pnand %p1249_p2, %p1735_p1 }
  0x7e   : > { %p1251_p3 = pneg %p1250_p10 }
 0x14c   : > { %v445_v8 = vpop.f32.mrb[0].mxu0  ;;  %v521_v14 = vpop.f32.mrb[0].mxu1 }
 0x14d   : > { %v446_v9 = vadd.f32 %v969_v7, %v445_v8  ;;  %v1014_v10 = vpop.f32.mrb[1].mxu0  ;;  %v1022_v15 = vpop.f32.mrb[1].mxu1  ;;  %v522_v22 = vadd.f32 %v973_v18, %v521_v14 }
 0x14e   : > { %v448_v11 = vpop.f32.mrb[2].mxu0  ;;  %v524_v16 = vpop.f32.mrb[2].mxu1 }
 0x14f   : > { %v451_v12 = vpack.c.bf16 %v446_v9, %v446_v9  ;;  %v1015_v13 = vpop.f32.mrb[3].mxu0  ;;  %v1023_v17 = vpop.f32.mrb[3].mxu1  ;;  %v527_v23 = vpack.c.bf16 %v522_v22, %v522_v22  ;;  %v983_v11 = vld [vmem:[%s1712_s7] ss:$0 sm:$0xff] }
 0x151   : > { %453 = vst.msk [vmem:[#allocation2] sm:$0xf] %vm452_vm2, %v451_v12 }
 0x158   : > { %v528_v19 = vld [vmem:[#allocation2] sm:$0xf] }
 0x159   : > { %v541_v20 = vsel %vm536_vm3, %v528_v19, 0  ;;  %v979_v21 = vcombine.low %v528_v19, %v528_v19 }
 0x15a   : > { %1025 = vmatpush3.bf16.xpose.msra.mxu0 %v541_v20 }
 0x15b   : > { %651 = vrot.lane.b32.xlu0 %v979_v21, %s1343_s19  ;;  %1036 = vmatprep.subr.bf16.mxu0 %v1341_v0 }
 0x15f   : > { %649 = vrot.lane.b32.xlu0 %v527_v23, %s1343_s19 }
 0x161   : > { %1027 = vmatmul.mubr.msk.bf16.vlgmr.msra.gmra.mrb[4].mxu0 %vm536_vm3, %v527_v23 }
 0x162   : > { %1038 = vmatprep.mubr.msk.bf16.mxu0 %vm1342_vm0, %v1341_v0 }
 0x1cd   : > { %v652_v24 = vpop.permute.xlu0 %651 }
 0x1ce   : > { %v657_v25 = vsel %vm536_vm3, %v652_v24, 0 }
 0x1cf   : > { %1037 = vmatpush3.bf16.xpose.msra.mxu0 %v657_v25 }
 0x1d0   : > { %1048 = vmatprep.subr.bf16.mxu0 %v1341_v0 }
 0x1d1   : > { %v650_v26 = vpop.permute.xlu0 %649 }
 0x1d6   : > { %1039 = vmatmul.mubr.msk.bf16.vlgmr.msra.gmra.mrb[8].mxu0 %vm536_vm3, %v650_v26 }
 0x1d7   : > { %1052 = vmatprep.mubr.msk.bf16.mxu0 %vm1342_vm0, %v1341_v0  ;;  %1049 = vmatpush3.bf16.msra.mxu0 %v1152_v62 }
 0x1d8   : > { %1050 = vmatprep.subr.bf16.mxu0 %v1341_v0 }
 0x1db   : > { %1051 = vmatpush3.bf16.msra.mxu0 %v1153_v4 }
 0x234   : > { %v577_v28 = vpop.f32.mrb[4].mxu0 }
 0x235   : > { %v578_v29 = vadd.f32 %v977_v27, %v577_v28  ;;  %v1028_v30 = vpop.f32.mrb[5].mxu0 }
 0x236   : > { %v580_v31 = vpop.f32.mrb[6].mxu0 }
 0x237   : > { %v1029_v32 = vpop.f32.mrb[7].mxu0  ;;  %v584_v33 = vsel %vm583_vm4, %v578_v29, -inf }
 0x238   : > { %585 = vmax.xlane.f32.xlu1 %v584_v33 }
 0x2a9   : > { %v693_v34 = vpop.f32.mrb[8].mxu0 }
 0x2aa   : > { %v694_v35 = vadd.f32 %v977_v27, %v693_v34  ;;  %v1040_v36 = vpop.f32.mrb[9].mxu0 }
 0x2ab   : > { %v696_v37 = vpop.f32.mrb[10].mxu0 }
 0x2ac   : > { %v1041_v38 = vpop.f32.mrb[11].mxu0  ;;  %v699_v39 = vsel %vm583_vm4, %v694_v35, -inf }
 0x2ad   : > { %700 = vmax.xlane.f32.xlu1 %v699_v39 }
 0x2be   : > { %599 = vrot.lane.b32.xlu1 %v979_v21, %s1344_s26 }
 0x2c5   : > { %v586_v40 = vpop.xlane.xlu1 %585 }
 0x2c6   : > { %v587_v41 = vsub.f32 %v578_v29, %v586_v40 }
 0x2c8   : > { %v588_v42 = vmul.f32 1.442695, %v587_v41 }
 0x2ca   : > { %1154 = vpow2.f32 %v588_v42 }
 0x2d4   : > { %v1155_v43 = vpop.eup %1154 }
 0x2d5   : > { %v590_v44 = vsel %vm583_vm4, %v1155_v43, 0.0 }
 0x2d6   : > { %591 = vadd.xlane.f32.xlu0 %v590_v44 }
 0x33a   : > { %v701_v45 = vpop.xlane.xlu1 %700 }
 0x33b   : > { %v702_v46 = vsub.f32 %v694_v35, %v701_v45 }
 0x33d   : > { %v703_v47 = vmul.f32 1.442695, %v702_v46 }
 0x33e   : > { %v600_v48 = vpop.permute.xlu1 %599 }
 0x33f   : > { %1156 = vpow2.f32 %v703_v47  ;;  %v606_v49 = vsel %vm604_vm5, %v600_v48, 0 }
 0x340   : > { %1031 = vmatpush3.bf16.msra.mxu1 %v606_v49 }
 0x341   : > { %1042 = vmatprep.subr.bf16.mxu1 %v1341_v0 }
 0x349   : > { %v1157_v50 = vpop.eup %1156 }
 0x34a   : > { %v705_v51 = vsel %vm583_vm4, %v1157_v50, 0.0 }
 0x34b   : > { %706 = vadd.xlane.f32.xlu1 %v705_v51 }
 0x35c   : > { %711 = vrot.lane.b32.xlu1 %v979_v21, %s1345_s22  ;;  %s1734_s22 = sld [smem:[#allocation15_spill]] }
 0x362   : > { %s1655_s23 = scalar_lea.hbm %s1734_s22, %s988_s8 }
 0x363   : > { %v592_v52 = vpop.xlane.xlu0 %591 }
 0x364   : > { %1158 = vrcp.f32 %v592_v52 }
 0x36e   : > { %v1159_v53 = vpop.eup %1158 }
 0x36f   : > { %v594_v54 = vmul.f32 %v1159_v53, %v1155_v43 }
 0x371   : > { %v595_v55 = vpack.c.bf16 %v594_v54, %v594_v54 }
 0x373   : > { %1033 = vmatmul.mubr.msk.bf16.vlgmr.msra.gmra.mrb[4].mxu1 %vm583_vm4, %v595_v55 }
 0x374   : > { %1044 = vmatprep.mubr.msk.bf16.mxu1 %vm1342_vm0, %v1341_v0 }
 0x3d8   : > { %v707_v56 = vpop.xlane.xlu1 %706 }
 0x3d9   : > { %1160 = vrcp.f32 %v707_v56 }
 0x3dc   : > { %v712_v57 = vpop.permute.xlu1 %711 }
 0x3dd   : > { %v717_v58 = vsel %vm604_vm5, %v712_v57, 0 }
 0x3de   : > { %1043 = vmatpush3.bf16.msra.mxu1 %v717_v58 }
 0x3e3   : > { %v1161_v59 = vpop.eup %1160 }
 0x3e4   : > { %v709_v60 = vmul.f32 %v1161_v59, %v1157_v50 }
 0x3e6   : > { %v710_v61 = vpack.c.bf16 %v709_v60, %v709_v60 }
 0x3e8   : > { %1045 = vmatmul.mubr.msk.bf16.vlgmr.msra.gmra.mrb[8].mxu1 %vm583_vm4, %v710_v61 }
 0x446   : > { %v642_v63 = vpop.f32.mrb[4].mxu1 }
 0x447   : > { %v1034_v1 = vpop.f32.mrb[5].mxu1 }
 0x448   : > { %v645_v2 = vpop.f32.mrb[6].mxu1 }
 0x449   : > { %v1035_v3 = vpop.f32.mrb[7].mxu1 }
 0x4bb   : > { %v753_v5 = vpop.f32.mrb[8].mxu1 }
 0x4bc   : > { %760 = vrot.lane.b32.xlu1 %v753_v5, %s1346_s15  ;;  %v1046_v6 = vpop.f32.mrb[9].mxu1  ;;  %s1254_s15 = scalar_lea.vmem %s1253_s13, 256 }
 0x4bd   : > { %v756_v7 = vpop.f32.mrb[10].mxu1  ;;  %p1256_p9 = scmp.lt.s32.totalorder %s1254_s15, %s1248_s12 }
 0x4be   : > { %v1047_v8 = vpop.f32.mrb[11].mxu1 }
 0x4bf   : > { %p1257_p11 = por %p1256_p9, %p1255_p5 }
 0x4c1   : > { %p1258_p0 = pnand %p1257_p11, %p1251_p3 }
 0x52e   : > { %v761_v9 = vpop.permute.xlu1 %760 }
 0x52f   : > { %v763_v0 = vsel %vm536_vm3, %v642_v63, %v761_v9 }
 0x530   : > { %v764_v10 = vpack.c.bf16 %v763_v0, %v763_v0 }
 0x532   : > { %1053 = vmatmul.mubr.msk.bf16.vlgmr.msra.gmra.mrb[12].mxu0 %vm407_vm1, %v764_v10 }
 0x605   : > { %v825_v12 = vpop.f32.mrb[12].mxu0 }
 0x606   : > { %v826_v13 = vadd.f32 %v983_v11, %v825_v12  ;;  %v1054_v14 = vpop.f32.mrb[13].mxu0 }
 0x607   : > { %v828_v15 = vpop.f32.mrb[14].mxu0 }
 0x608   : > { %v1055_v16 = vpop.f32.mrb[15].mxu0  ;;  %831 = vst.msk [vmem:[%s374_s27] sm:$0xff] %vm407_vm1, %v826_v13 }
 0x609   : > { %1261 = shalt.err (!%p1258_p0)
}
 0x60a   : > { %s1262_s25 = scalar_lea.hbm %s1655_s23, 128  ;;  %s1266_s19 = scalar_lea.hbm %s1734_s22, 256 }
 0x60b   : > { %p1263_p4 = scmp.ne.s32.totalorder %s1655_s23, %s1262_s25  ;;  %p1267_p7 = scmp.lt.u32.totalorder %s1655_s23, %s1734_s22 }
 0x60c   : > { %p1268_p12 = scmp.lt.u32.totalorder %s1266_s19, %s1262_s25  ;;  %p1270_p2 = scmp.lt.u32.totalorder %s1262_s25, %s1655_s23 }
 0x60d   : > { %p1264_p13 = pnand %p1263_p4, %p1735_p1 }
 0x60e   : > { %p1269_p8 = por %p1268_p12, %p1267_p7 }
 0x60f   : > { %p1265_p6 = pneg %p1264_p13 }
 0x610   : > { %p1271_p10 = por %p1270_p2, %p1269_p8 }
 0x612   : > { %p1272_p3 = pnand %p1271_p10, %p1265_p6 }
 0x614   : > { %1275 = shalt.err (!%p1272_p3)
}
 0x615   : > { %1066 = dma.vmem_to_hbm [thread:$0]  (%p1735_p1), %s1657_s11, 128, %s1655_s23, %s833_s30  }
 0x616 PF: > { %s1736_s14 = sld [smem:[#allocation13_spill]]  ;;  %s1737_s26 = sld [smem:[#allocation14_spill]] }
 0x617   : > { %p1739_p9 = scmp.ge.s32.totalorder %s1334_s10, 2 }
 0x61c   : > { %s859_s12 = sand.u32 1, %s1736_s14   ;;  %p1738_p5 = scmp.ne.s32.totalorder %s1737_s26, 0 }
 0x61d   : > { %s860_s18 = scalar_lea.sflag [#allocation5], %s859_s12 }
 0x61e   : > { %p1080_p11 = pnand %p1739_p9, %p1738_p5 }
 0x620   : > { %1309 = dma.done.wait (!%p1080_p11), %s860_s18, 128  }
 0x621   : > { %1311 = vsyncadd (!%p1080_p11), %s860_s18, 4294967168  ;;  %s25_s10 = sadd.s32 1, %s1334_s10   ;;  %s1740_s27 = smov %s1318_s28 }
 0x622   : > { %p22_p0 = scmp.ge.s32.totalorder %s25_s10, 4   ;;  %s1741_s28 = smov %s1322_s29 }
 0x623   : > { %s1742_s29 = smov %s1535_s24  ;;  %s1743_s30 = smov %s1330_s9 }
 0x624   : > { %s1744_s9 = smov %s1746_s16  ;;  %24 = sbr.rel (!%p22_p0) target bundleno = 9 (0x9), region = 113 }
 0x62b   :  { %865 = vsyncpa [#allocation4], 1 }
 0x62c   :  { %867 = vsyncpa [#allocation4 + $0x1], 1 }
 0x62d   :  { %868 = vsyncpa [#allocation7], 1 }
 0x62e   :  { %869 = vsyncpa [#allocation5], 1 }
 0x62f   :  { %871 = vsyncpa [#allocation5 + $0x1], 1 }

</bundles_post_ra>
